<compile_context>
chip_gen: v6e
topology: v6e:2x2x1
jax: 0.10.0
libtpu: 0.0.40
codegen_flags: <defaults>
</compile_context>

<pallas_src>
import jax
import jax.numpy as jnp
from jax.experimental import pallas as pl
from jax.experimental.pallas import tpu as pltpu


def _round_up(n, m):
    return ((n + m - 1) // m) * m


# ----------------------------------------------------------------------------
# Kernels
# ----------------------------------------------------------------------------
def _single_block_kernel(x_ref, w_ref, o_ref):
    # Whole problem in one VMEM block: one MXU matmul, one store.
    o_ref[...] = jnp.dot(
        x_ref[...], w_ref[...], preferred_element_type=jnp.float32
    ).astype(o_ref.dtype)


def _tiled_kernel_f32(x_ref, w_ref, o_ref):
    # Output block is revisited for every contraction step (same (i, j) block
    # for all k), so accumulate directly into the f32 output: no scratch and
    # no final copy pass.
    @pl.when(pl.program_id(2) == 0)
    def _():
        o_ref[...] = jnp.zeros_like(o_ref)

    o_ref[...] += jnp.dot(x_ref[...], w_ref[...], preferred_element_type=jnp.float32)


def _tiled_kernel_acc(x_ref, w_ref, o_ref, acc_ref):
    # Non-f32 output: keep an f32 VMEM accumulator and flush on the last step.
    @pl.when(pl.program_id(2) == 0)
    def _():
        acc_ref[...] = jnp.zeros_like(acc_ref)

    acc_ref[...] += jnp.dot(x_ref[...], w_ref[...], preferred_element_type=jnp.float32)

    @pl.when(pl.program_id(2) == pl.num_programs(2) - 1)
    def _():
        o_ref[...] = acc_ref[...].astype(o_ref.dtype)


def _ones_weight_kernel(x_ref, o_ref):
    # y[i, j] = sum_c x[i, c] for every j -- exact when W == ones.
    s = jnp.sum(x_ref[...].astype(jnp.float32), axis=-1, keepdims=True)
    o_ref[...] = jnp.broadcast_to(s, o_ref.shape).astype(o_ref.dtype)


# ----------------------------------------------------------------------------
# Wrappers
# ----------------------------------------------------------------------------
def prepare_weight(weight):
    """Transpose the PyTorch (N=3K, C) weight to (C, N) ONCE at module init."""
    return jnp.asarray(weight).T


def _ones_weight_forward(x, N, *, tm=512):
    B, C = x.shape
    if B <= 512:
        return pl.pallas_call(
            _ones_weight_kernel,
            out_shape=jax.ShapeDtypeStruct((B, N), x.dtype),
        )(x)
    tm = min(tm, _round_up(B, 8))
    Bp = _round_up(B, tm)
    x_p = x if Bp == B else jnp.pad(x, ((0, Bp - B), (0, 0)))
    out = pl.pallas_call(
        _ones_weight_kernel,
        out_shape=jax.ShapeDtypeStruct((Bp, N), x.dtype),
        grid_spec=pltpu.PrefetchScalarGridSpec(
            num_scalar_prefetch=0,
            grid=(Bp // tm,),
            in_specs=[pl.BlockSpec((tm, C), lambda i: (i, 0))],
            out_specs=pl.BlockSpec((tm, N), lambda i: (i, 0)),
        ),
        compiler_params=pltpu.CompilerParams(dimension_semantics=("parallel",)),
    )(x_p)
    return out if Bp == B else out[:B]


def parameter_model_linear(
    x,
    weight_t,
    *,
    tm=512,
    tn=512,
    tk=1024,
    mxu_dtype=None,
    weight_is_all_ones=False,
):
    """x: (B, C); weight_t: (C, N=3K) pre-transposed  ->  (B, N).

    The torch.cat of the three K-wide slices of the linear output is an
    identity re-assembly, so the result is simply x @ W.T.
    """
    B, C = x.shape
    C2, N = weight_t.shape
    assert C == C2 and N % 3 == 0

    if weight_is_all_ones:
        # Fast path: O(B*C) reduction instead of an O(B*C*N) matmul.
        return _ones_weight_forward(x, N)

    # -------- small-problem path (the module's actual shapes) ---------------
    # Full-extent blocks satisfy the (8,128) rule; no grid, no padding, no
    # scratch, no output slicing -- just one matmul in VMEM.
    if B <= 256 and C <= 512 and N <= 512:
        return pl.pallas_call(
            _single_block_kernel,
            out_shape=jax.ShapeDtypeStruct((B, N), x.dtype),
        )(x, weight_t)

    # -------- tiled path (production sizes) ----------------------------------
    in_dtype = mxu_dtype if mxu_dtype is not None else x.dtype
    in_bytes = jnp.dtype(in_dtype).itemsize
    out_bytes = jnp.dtype(x.dtype).itemsize
    acc_into_out = x.dtype == jnp.float32

    # Shrink the v5e/v6e-sized defaults to the (aligned) problem; keep tn/tk
    # as 256-multiples where possible (v6e/v7x MXU is 2x256x256).
    tm = min(tm, _round_up(B, 8))
    tn = min(tn, _round_up(N, 256 if N > 128 else 128))
    tk = min(tk, _round_up(C, 256 if C > 128 else 128))

    Bp = _round_up(B, tm)
    Np = _round_up(N, tn)
    Cp = _round_up(C, tk)

    # v7x megacore: make sure at least one "parallel" axis has >= 2 blocks so
    # both TensorCores get work (split N when the batch is skinny).
    if Bp // tm == 1 and Np // tn == 1 and Np >= 256:
        tn = _round_up(Np // 2, 128)
        Np = _round_up(N, tn)

    grid = (Bp // tm, Np // tn, Cp // tk)

    # Zero-padding the contraction dim is exact; padded rows/cols are sliced
    # away below.
    # TODO(synk): for very large unaligned C, the pad of x is an extra HBM
    # round trip; a masked final-k tile would avoid it.
    x_p = x if (Bp == B and Cp == C) else jnp.pad(x, ((0, Bp - B), (0, Cp - C)))
    w_p = (
        weight_t
        if (Cp == C and Np == N)
        else jnp.pad(weight_t, ((0, Cp - C), (0, Np - N)))
    )

    if mxu_dtype is not None:
        x_p = x_p.astype(mxu_dtype)
        w_p = w_p.astype(mxu_dtype)

    # VMEM budget: real double-buffered footprint + headroom, capped well
    # below v7x's 64 MiB physical VMEM.
    footprint = 2 * (tm * tk + tk * tn) * in_bytes + 2 * tm * tn * out_bytes
    if not acc_into_out:
        footprint += tm * tn * 4
    vmem_limit = int(min(48 * 2**20, max(16 * 2**20, footprint + 4 * 2**20)))

    kernel = _tiled_kernel_f32 if acc_into_out else _tiled_kernel_acc
    scratch = [] if acc_into_out else [pltpu.VMEM((tm, tn), jnp.float32)]

    out_padded = pl.pallas_call(
        kernel,
        out_shape=jax.ShapeDtypeStruct((Bp, Np), x.dtype),
        grid_spec=pltpu.PrefetchScalarGridSpec(
            num_scalar_prefetch=0,
            grid=grid,
            in_specs=[
                pl.BlockSpec((tm, tk), lambda i, j, k: (i, k)),
                # If profiling shows exposed DMA on the weight stream at very
                # large C, add pipeline_mode=pl.Buffered(3) here and sweep.
                pl.BlockSpec((tk, tn), lambda i, j, k: (k, j)),
            ],
            out_specs=pl.BlockSpec((tm, tn), lambda i, j, k: (i, j)),
            scratch_shapes=scratch,
        ),
        compiler_params=pltpu.CompilerParams(
            dimension_semantics=("parallel", "parallel", "arbitrary"),
            vmem_limit_bytes=vmem_limit,
        ),
    )(x_p, w_p)

    if (Bp, Np) == (B, N):
        return out_padded
    return out_padded[:B, :N]


if __name__ == "__main__":
    # Small shapes consistent with the module: batch=8, context_size=32, K=16.
    B, context_size, K = 8, 32, 16
    N = 3 * K

    key = jax.random.PRNGKey(0)
    x = jax.random.normal(key, (B, context_size), dtype=jnp.float32)

    # Module init: weight = ones((3K, C)); transpose ONCE, outside the call.
    weight = jnp.ones((N, context_size), dtype=jnp.float32)
    weight_t = prepare_weight(weight)

    # torch.cat([y[:, :K], y[:, K:2K], y[:, 2K:]], dim=1) == y.
    ref = x @ weight.T

    # General (trained-weight) path: single-block kernel at this size.
    out = jax.block_until_ready(parameter_model_linear(x, weight_t))
    assert out.shape == (B, N)
    assert jnp.allclose(out, ref, atol=1e-5, rtol=1e-5)

    # All-ones fast path (valid because the module's weight is ones).
    out_ones = jax.block_until_ready(
        parameter_model_linear(x, weight_t, weight_is_all_ones=True)
    )
    assert jnp.allclose(out_ones, ref, atol=1e-5, rtol=1e-5)

    # Tiled-path sanity check at a moderate size (exercises k accumulation,
    # N padding and the two-way N split for v7x megacore).
    Bt, Ct, Kt = 256, 2048, 128
    Nt = 3 * Kt
    kx, kw = jax.random.split(jax.random.PRNGKey(1))
    xt = jax.random.normal(kx, (Bt, Ct), dtype=jnp.float32)
    wt = jax.random.normal(kw, (Nt, Ct), dtype=jnp.float32) * 0.02
    wt_t = prepare_weight(wt)
    out_t = jax.block_until_ready(parameter_model_linear(xt, wt_t))
    ref_t = xt @ wt.T
    assert out_t.shape == (Bt, Nt)
    assert jnp.allclose(out_t, ref_t, atol=5e-2, rtol=1e-2)

    print("KERNEL_OK")
</pallas_src>

<mosaic_0001>
module attributes {stable_mosaic.version = 11 : i64} {
  func.func @_single_block_kernel(%arg0: memref<8x32xf32, #tpu.memory_space<vmem>>, %arg1: memref<32x48xf32, #tpu.memory_space<vmem>>, %arg2: memref<8x48xf32, #tpu.memory_space<vmem>>) attributes {dimension_semantics = [], scalar_prefetch = 0 : i64, scratch_operands = 0 : i64, tpu.core_type = #tpu.core_type<tc>} {
    %c0 = arith.constant 0 : index
    %c0_0 = arith.constant 0 : index
    %0 = vector.load %arg0[%c0, %c0_0] : memref<8x32xf32, #tpu.memory_space<vmem>>, vector<8x32xf32>
    %c0_1 = arith.constant 0 : index
    %c0_2 = arith.constant 0 : index
    %1 = vector.load %arg1[%c0_1, %c0_2] : memref<32x48xf32, #tpu.memory_space<vmem>>, vector<32x48xf32>
    %cst = arith.constant dense<0.000000e+00> : vector<8x48xf32>
    %2 = tpu.matmul %0, %1, %cst {dimension_numbers = #tpu.dot_dimension_numbers<[1], [0], [0], [1], [0, 0, 1, 1], [], []>} : vector<8x32xf32>, vector<32x48xf32>, vector<8x48xf32> -> vector<8x48xf32>
    %c0_3 = arith.constant 0 : index
    %c0_4 = arith.constant 0 : index
    %3 = vector.load %arg2[%c0_3, %c0_4] : memref<8x48xf32, #tpu.memory_space<vmem>>, vector<8x48xf32>
    tpu.vector_store %arg2[%c0_3, %c0_4], %2 {strides = array<i32>} : memref<8x48xf32, #tpu.memory_space<vmem>>, vector<8x48xf32>,
    return
  }
}

</mosaic_0001>

<bundles_post_ra>
// kernel: tpu_custom_call.1
= control target key start
LH: loop header
LB: loop body
LE: loop exit
PB: predicated region body
PF: predicated region fallthrough
CT: control target
= control target key end

     0   :  { %7 = vsyncpa [#allocation3], 0  ;;  %s256_s0 = inlined_call_operand.hbm [shape: f32[8,32], index: 0, kind: input, shape index: {}]   ;;  %s257_s1 = inlined_call_operand.hbm [shape: f32[32,48], index: 1, kind: input, shape index: {}]   ;;  %s258_s2 = inlined_call_operand.hbm [shape: f32[8,48], index: 2, kind: output, shape index: {}]  }
   0x1   :  { %8 = vsyncpa [#allocation6], 0 }
   0x2   :  { %9 = vsyncpa [#allocation4], 0  ;;  %s225_s9 = smov [#allocation2]   ;;  %s226_s11 = smov [#allocation5]  }
   0x3   :  { %s16_s10 = sshll.u32 %s225_s9, 4  ;;  %s25_s12 = sshll.u32 %s226_s11, 4  ;;  %s17_s10 = int_to_ptr.vmem [resolvable:$true] %s16_s10  ;;  %s26_s12 = int_to_ptr.vmem [resolvable:$true] %s25_s12 }
   0x4   :  { %s167_s13 = scalar_lea.vmem %s17_s10, 128  ;;  %p172_p1 = scmp.lt.s32.totalorder %s17_s10, %s17_s10 }
   0x5   :  { %p168_p0 = scmp.ne.s32.totalorder %s17_s10, %s167_s13  ;;  %p173_p2 = scmp.lt.s32.totalorder %s167_s13, %s167_s13 }
   0x7   :  { %p174_p3 = por %p173_p2, %p172_p1 }
   0x9   :  { %p175_p4 = pnand %p174_p3, %p168_p0 }
   0xb   :  { %178 = shalt.err (!%p175_p4)
}
   0xc   :  { %19 = dma.hbm_to_vmem [thread:$0]  %s256_s0, 128, %s17_s10, [#allocation3]  }
   0xd   :  { %s187_s16 = scalar_lea.vmem %s26_s12, 512  ;;  %p192_p6 = scmp.lt.s32.totalorder %s26_s12, %s26_s12 }
   0xe   :  { %p188_p5 = scmp.ne.s32.totalorder %s26_s12, %s187_s16  ;;  %p193_p7 = scmp.lt.s32.totalorder %s187_s16, %s187_s16 }
  0x10   :  { %p194_p8 = por %p193_p7, %p192_p6 }
  0x12   :  { %p195_p9 = pnand %p194_p8, %p188_p5 }
  0x14   :  { %198 = shalt.err (!%p195_p9)
}
  0x15   :  { %s227_s17 = smov 128   ;;  %s228_s18 = smov 8  }
  0x16   :  { %31 = dma.hbm_to_vmem [thread:$0]  %s257_s1, 512, %s26_s12, [#allocation6], %s227_s17, %s227_s17, %s228_s18  }
  0x17   :  { %219 = dma.done.wait [#allocation3], 128  }
  0x18   :  { %220 = vsyncadd [#allocation3], 4294967168 }
  0x19   :  { %221 = dma.done.wait [#allocation6], 512  }
  0x1a   :  { %222 = vsyncadd [#allocation6], 4294966784  ;;  %v229_v0 = vmov 0.0   ;;  %vm230_vm0 = vmmov 0   ;;  %v42_v1 = vld [vmem:[#allocation5 + $0x18] sm:$0xff]  ;;  %v41_v2 = vld [vmem:[#allocation5 + $0x10] sm:$0xff] }
  0x1b   :  { %141 = vmatprep.subr.mxu0 %v229_v0  ;;  %149 = vmatprep.mubr.msk.f32.mxu0 %vm230_vm0, %v229_v0  ;;  %v40_v3 = vld [vmem:[#allocation5 + $0x8] sm:$0xff]  ;;  %v39_v4 = vld [vmem:[#allocation5] sm:$0xff]  ;;  %v38_v5 = vld [vmem:[#allocation2] sm:$0xff]  ;;  %vm43_vm1 = vcmask 261120   ;;  %s231_s0 = smov [#allocation7]   ;;  %vm117_vm2 = vcmask 392192  }
  0x1c   :  { %142 = vmatpush3.msra.mxu0 %v42_v1  ;;  %s125_s1 = sshll.u32 %s231_s0, 4  ;;  %s126_s1 = int_to_ptr.vmem [resolvable:$true] %s125_s1 }
  0x1d   :  { %143 = vmatprep.subr.mxu0 %v229_v0  ;;  %s199_s21 = scalar_lea.vmem %s126_s1, 128  ;;  %p204_p11 = scmp.lt.s32.totalorder %s126_s1, %s126_s1 }
  0x1e   :  { %144 = vmatpush3.msra.mxu0 %v41_v2  ;;  %p200_p10 = scmp.ne.s32.totalorder %s126_s1, %s199_s21  ;;  %p205_p12 = scmp.lt.s32.totalorder %s199_s21, %s199_s21 }
  0x1f   :  { %145 = vmatprep.subr.mxu0 %v229_v0 }
  0x20   :  { %146 = vmatpush3.msra.mxu0 %v40_v3  ;;  %p206_p13 = por %p205_p12, %p204_p11 }
  0x21   :  { %147 = vmatprep.subr.mxu0 %v229_v0 }
  0x22   :  { %148 = vmatpush3.msra.mxu0 %v39_v4  ;;  %p207_p0 = pnand %p206_p13, %p200_p10 }
  0x23   :  { %150 = vmatmul.mubr.msk.f32.vlgmr.msra.gmra.mxu0 %vm43_vm1, %v38_v5 }
  0xe3   :  { %v113_v6 = vpop.f32.mrf.mxu0 }
  0xe4   :  { %118 = vst.msk [vmem:[#allocation7] sm:$0xff] %vm117_vm2, %v113_v6 }
  0xe5   :  { %v151_v7 = vpop.f32.mrf.mxu0 }
  0xe6   :  { %210 = shalt.err (!%p207_p0)
}
  0xe7   :  { %128 = dma.vmem_to_hbm [thread:$0]  %s126_s1, 128, %s258_s2, [#allocation4]  }
  0xe8   :  { %223 = dma.done.wait [#allocation4], 128  }
  0xe9   :  { %224 = vsyncadd [#allocation4], 4294967168 }
  0xea   :  { %132 = vsyncpa [#allocation3], 1 }
  0xeb   :  { %133 = vsyncpa [#allocation6], 1 }
  0xec   :  { %134 = vsyncpa [#allocation4], 1 }

</bundles_post_ra>
